<compile_context>
chip_gen: v7x
topology: tpu7x:2x2x1
jax: 0.10.0
libtpu: 0.0.40
codegen_flags: <defaults>
</compile_context>

<pallas_src>
import functools

import jax
import jax.numpy as jnp
from jax import lax
from jax.experimental import pallas as pl
from jax.experimental.pallas import tpu as pltpu


# ---------------------------------------------------------------------------
# Generation-aware VMEM sizing (computed once at import; safe fallback = v7x).
# ---------------------------------------------------------------------------
try:
    _PHYS_VMEM = int(pltpu.get_tpu_info().vmem_capacity_bytes)
except Exception:  # pragma: no cover - conservative fallback (v7x per-TC VMEM)
    _PHYS_VMEM = 64 << 20
# Leave headroom for compiler-internal scratch / semaphores; never ask for all of it.
_VMEM_LIMIT = min(_PHYS_VMEM * 3 // 4, 96 << 20)
# in + out double-buffered (4x block) plus a couple of block-sized temporaries must fit.
_BLOCK_BUDGET = _VMEM_LIMIT // 8


def _reduce_nc(t):
    # Per-channel reduction: batch (axis 0) first via cheap VPU adds, then ONE
    # cross-lane XLU reduction over the spatial/lane axis (axis 2).
    return jnp.sum(jnp.sum(t, axis=0, keepdims=True), axis=2, keepdims=True)


# ---------------------------------------------------------------------------
# Path A: fused single-block-per-channel-tile kernel (1 HBM read + 1 write).
# ---------------------------------------------------------------------------
def bn2d_fused_kernel(x_ref, gamma_ref, beta_ref, o_ref):
    # x_ref / o_ref: (N, TC, HW) f32 ; gamma_ref / beta_ref: (1, TC, 1) f32
    x = x_ref[...]
    n, _, hw = x.shape
    m = n * hw  # elements per channel (static)

    # ---- pass 1 (single sweep): raw moments -> mean / unbiased var (torch ddof=1) ----
    s1 = _reduce_nc(x)
    s2 = _reduce_nc(x * x)
    mean = s1 * jnp.float32(1.0 / m)                                  # (1, TC, 1)
    var = (s2 - s1 * mean) * jnp.float32(1.0 / (m - 1))               # (1, TC, 1)
    var = jnp.maximum(var, jnp.float32(0.0))                          # guard cancellation

    # ---- 3-sigma selection threshold (per-channel scalar math only) ----
    thr = jnp.float32(3.0) * jnp.sqrt(var + jnp.float32(1e-10))       # (1, TC, 1)

    # ---- pass 2 (single sweep): robust sums via predicated selects ----
    d = x - mean                                    # recomputed, never round-tripped
    mask = jnp.abs(d) < thr
    cnt = _reduce_nc(jnp.where(mask, jnp.float32(1.0), jnp.float32(0.0)))
    sd = _reduce_nc(jnp.where(mask, d, jnp.float32(0.0)))
    sdd = _reduce_nc(jnp.where(mask, d * d, jnp.float32(0.0)))

    # NOTE: cnt == 0 (all elements rejected) gives inf/nan, matching the PyTorch module.
    inv_cnt = jnp.float32(1.0) / cnt
    dmean = sd * inv_cnt
    rmean = mean + dmean                                              # robust mean
    rvar = jnp.maximum(sdd * inv_cnt - dmean * dmean, jnp.float32(0.0))  # robust var >= 0

    # ---- folded affine: per-element hot path is one mul + one add ----
    scale = gamma_ref[...] * lax.rsqrt(rvar + jnp.float32(1e-20))     # (1, TC, 1)
    bias = beta_ref[...] - rmean * scale                              # (1, TC, 1)
    o_ref[...] = x * scale + bias


def _pick_channel_tile(N, C, HW, block_budget_bytes, min_grid=4):
    """Channel tile for the fused path, or None if even the smallest legal tile
    exceeds the per-block budget (caller then uses the spatially tiled path).
    Prefers >= min_grid grid steps so each TensorCore keeps >= 2 pipelined steps
    under megacore sharding; falls back to >= 2 steps, then the largest fit."""
    bpe = 4
    if C % 8 != 0:
        # Only the full-extent channel block is a legal BlockSpec.
        return C if N * C * HW * bpe <= block_budget_bytes else None
    candidates = [tc for tc in range(8, C + 1, 8)
                  if C % tc == 0 and N * tc * HW * bpe <= block_budget_bytes]
    if not candidates:
        return None
    for steps in (min_grid, 2, 1):
        ok = [tc for tc in candidates if C // tc >= steps]
        if ok:
            return max(ok)
    return max(candidates)


def _bn2d_fused(x, g, b, tc, vmem_limit):
    N, C, HW = x.shape
    return pl.pallas_call(
        bn2d_fused_kernel,
        out_shape=jax.ShapeDtypeStruct((N, C, HW), jnp.float32),
        grid=(C // tc,),
        in_specs=[
            pl.BlockSpec((N, tc, HW), lambda c: (0, c, 0)),
            pl.BlockSpec((1, tc, 1), lambda c: (0, c, 0)),
            pl.BlockSpec((1, tc, 1), lambda c: (0, c, 0)),
        ],
        out_specs=pl.BlockSpec((N, tc, HW), lambda c: (0, c, 0)),
        compiler_params=pltpu.CompilerParams(
            dimension_semantics=("parallel",),   # channels independent -> megacore
            vmem_limit_bytes=vmem_limit,
        ),
    )(x, g, b)


# ---------------------------------------------------------------------------
# Path B: spatially tiled multi-pass path for activations too big for one block.
# (3 HBM reads + 1 write of x — unavoidable for a data-dependent 3-sigma filter.)
# ---------------------------------------------------------------------------
def _moments_kernel(x_ref, s1_ref, s2_ref):
    @pl.when(pl.program_id(1) == 0)
    def _():
        s1_ref[...] = jnp.zeros_like(s1_ref)
        s2_ref[...] = jnp.zeros_like(s2_ref)
    x = x_ref[...]
    s1_ref[...] += _reduce_nc(x)
    s2_ref[...] += _reduce_nc(x * x)


def _robust_sums_kernel(x_ref, mean_ref, thr_ref, cnt_ref, sd_ref, sdd_ref):
    @pl.when(pl.program_id(1) == 0)
    def _():
        cnt_ref[...] = jnp.zeros_like(cnt_ref)
        sd_ref[...] = jnp.zeros_like(sd_ref)
        sdd_ref[...] = jnp.zeros_like(sdd_ref)
    d = x_ref[...] - mean_ref[...]
    mask = jnp.abs(d) < thr_ref[...]
    cnt_ref[...] += _reduce_nc(jnp.where(mask, jnp.float32(1.0), jnp.float32(0.0)))
    sd_ref[...] += _reduce_nc(jnp.where(mask, d, jnp.float32(0.0)))
    sdd_ref[...] += _reduce_nc(jnp.where(mask, d * d, jnp.float32(0.0)))


def _apply_kernel(x_ref, scale_ref, bias_ref, o_ref):
    o_ref[...] = x_ref[...] * scale_ref[...] + bias_ref[...]


def _pick_tiled_tiles(N, C, HW, block_budget_bytes):
    """(TC, THW) for the tiled path; raises if nothing legal fits the budget."""
    bpe = 4
    c_opts = [C] if C % 8 != 0 else [tc for tc in range(8, C + 1, 8) if C % tc == 0]
    hw_opts = [HW] if HW % 128 != 0 else [t for t in range(128, HW + 1, 128) if HW % t == 0]
    best = None
    for tc in c_opts:
        for thw in hw_opts:
            blk = N * tc * thw * bpe
            if blk > block_budget_bytes:
                continue
            # Prefer >= 2 spatial steps (keeps the reduction axis pipelined),
            # then the largest block (amortizes ~0.35us per-grid-step overhead).
            key = (1 if HW // thw >= 2 else 0, blk)
            if best is None or key > best[0]:
                best = (key, tc, thw)
    if best is None:
        raise ValueError(
            f"BN2d Pallas kernel: no (channel, spatial) tile of x (N={N}, C={C}, "
            f"HW={HW}) fits the per-block VMEM budget of {block_budget_bytes} bytes.")
    return best[1], best[2]


def _bn2d_tiled(x, g, b, tc, thw, vmem_limit):
    N, C, HW = x.shape
    m = N * HW
    grid = (C // tc, HW // thw)
    x_spec = pl.BlockSpec((N, tc, thw), lambda c, h: (0, c, h))
    ch_spec = pl.BlockSpec((1, tc, 1), lambda c, h: (0, c, 0))
    stats_shape = jax.ShapeDtypeStruct((1, C, 1), jnp.float32)
    reduce_params = pltpu.CompilerParams(
        dimension_semantics=("parallel", "arbitrary"),  # spatial reduction axis last
        vmem_limit_bytes=vmem_limit,
    )

    # Pass 1: raw per-channel moments.
    s1, s2 = pl.pallas_call(
        _moments_kernel,
        out_shape=(stats_shape, stats_shape),
        grid=grid,
        in_specs=[x_spec],
        out_specs=(ch_spec, ch_spec),
        compiler_params=reduce_params,
    )(x)
    mean = s1 / m
    var = jnp.maximum((s2 - s1 * mean) / (m - 1), 0.0)
    thr = 3.0 * jnp.sqrt(var + 1e-10)

    # Pass 2: robust (3-sigma selected) sums.
    cnt, sd, sdd = pl.pallas_call(
        _robust_sums_kernel,
        out_shape=(stats_shape, stats_shape, stats_shape),
        grid=grid,
        in_specs=[x_spec, ch_spec, ch_spec],
        out_specs=(ch_spec, ch_spec, ch_spec),
        compiler_params=reduce_params,
    )(x, mean, thr)
    # NOTE: cnt == 0 (all rejected) gives inf/nan, matching the PyTorch module.
    dmean = sd / cnt
    rmean = mean + dmean
    rvar = jnp.maximum(sdd / cnt - dmean * dmean, 0.0)
    scale = g * lax.rsqrt(rvar + 1e-20)
    bias = b - rmean * scale

    # Pass 3: apply folded per-channel affine.
    return pl.pallas_call(
        _apply_kernel,
        out_shape=jax.ShapeDtypeStruct((N, C, HW), jnp.float32),
        grid=grid,
        in_specs=[x_spec, ch_spec, ch_spec],
        out_specs=x_spec,
        compiler_params=pltpu.CompilerParams(
            dimension_semantics=("parallel", "parallel"),
            vmem_limit_bytes=vmem_limit,
        ),
    )(x, scale, bias)


# ---------------------------------------------------------------------------
# Public wrapper.
# ---------------------------------------------------------------------------
@functools.partial(jax.jit, static_argnames=("force_tiled",))
def bn2d_pallas(x_nchw, gamma, beta, force_tiled=False):
    """x_nchw: (N, C, H, W) f32; gamma, beta: (C,) f32. Returns (N, C, H, W)."""
    N, C, H, W = x_nchw.shape
    HW = H * W

    # Free, contiguous reshapes only — no HBM transpose passes.
    x = x_nchw.reshape(N, C, HW).astype(jnp.float32)
    g = gamma.reshape(1, C, 1).astype(jnp.float32)
    b = beta.reshape(1, C, 1).astype(jnp.float32)

    tc = None if force_tiled else _pick_channel_tile(N, C, HW, _BLOCK_BUDGET)
    if tc is not None:
        out = _bn2d_fused(x, g, b, tc, _VMEM_LIMIT)
    else:
        tct, thw = _pick_tiled_tiles(N, C, HW, _BLOCK_BUDGET)
        out = _bn2d_tiled(x, g, b, tct, thw, _VMEM_LIMIT)
    return out.reshape(N, C, H, W)


def bn2d_ref(x, gamma, beta):
    """Pure-JAX reference mirroring the PyTorch forward exactly."""
    N, C, H, W = x.shape
    xc = jnp.transpose(x, (1, 0, 2, 3)).reshape(C, -1)
    mean = jnp.mean(xc, axis=-1)
    var = jnp.var(xc, axis=-1, ddof=1)  # torch.var unbiased=True
    mean_b = mean.reshape(1, C, 1, 1)
    var_b = var.reshape(1, C, 1, 1)
    normalized = (x - mean_b) / jnp.sqrt(var_b + 1e-10)
    sel = ((normalized < 3.0) & (normalized > -3.0)).astype(x.dtype)
    cnt = jnp.sum(sel, axis=(0, 2, 3))
    rmean = (jnp.sum(x * sel, axis=(0, 2, 3)) / cnt).reshape(1, C, 1, 1)
    d2 = (x - rmean) ** 2
    rvar = (jnp.sum(d2 * sel, axis=(0, 2, 3)) / cnt).reshape(1, C, 1, 1)
    g = gamma.reshape(1, C, 1, 1)
    b = beta.reshape(1, C, 1, 1)
    return g * (x - rmean) / jnp.sqrt(rvar + 1e-20) + b


if __name__ == "__main__":
    N, C, H, W = 2, 4, 16, 16
    key = jax.random.PRNGKey(0)
    x = jax.random.normal(key, (N, C, H, W), dtype=jnp.float32) * 2.0 + 0.5

    # deterministic params, matching __init__: beta = zeros(C), gamma = ones(C)
    beta = jnp.zeros((C,), dtype=jnp.float32)
    gamma = jnp.ones((C,), dtype=jnp.float32)

    ref = bn2d_ref(x, gamma, beta)

    # Fused single-block path (the one real small shapes take).
    out_fused = bn2d_pallas(x, gamma, beta)
    jax.block_until_ready(out_fused)
    assert out_fused.shape == (N, C, H, W)
    assert jnp.allclose(out_fused, ref, atol=1e-4, rtol=1e-4), "fused path mismatch"

    # Exercise the spatially tiled multi-pass path (used for production-sized
    # activations): HW=256 -> two 128-wide spatial tiles with resident accumulators.
    out_tiled = bn2d_pallas(x, gamma, beta, force_tiled=True)
    jax.block_until_ready(out_tiled)
    assert jnp.allclose(out_tiled, ref, atol=1e-4, rtol=1e-4), "tiled path mismatch"

    print("KERNEL_OK")
</pallas_src>

<mosaic_0001>
module attributes {stable_mosaic.version = 11 : i64} {
  func.func @bn2d_fused_kernel(%arg0: i32, %arg1: memref<2x4x256xf32, #tpu.memory_space<vmem>>, %arg2: memref<1x4x1xf32, #tpu.memory_space<vmem>>, %arg3: memref<1x4x1xf32, #tpu.memory_space<vmem>>, %arg4: memref<2x4x256xf32, #tpu.memory_space<vmem>>) attributes {dimension_semantics = [#tpu.dimension_semantics<parallel>], iteration_bounds = array<i64: 1>, scalar_prefetch = 0 : i64, scratch_operands = 0 : i64, tpu.core_type = #tpu.core_type<tc>, window_params = [{transform_indices = @transform_0, window_bounds = array<i64: 2, 4, 256>}, {transform_indices = @transform_1, window_bounds = array<i64: 1, 4, 1>}, {transform_indices = @transform_2, window_bounds = array<i64: 1, 4, 1>}, {transform_indices = @transform_3, window_bounds = array<i64: 2, 4, 256>}]} {
    %c0 = arith.constant 0 : index
    %c0_0 = arith.constant 0 : index
    %c0_1 = arith.constant 0 : index
    %0 = vector.load %arg1[%c0, %c0_0, %c0_1] : memref<2x4x256xf32, #tpu.memory_space<vmem>>, vector<2x4x256xf32>
    %cst = arith.constant dense<0.000000e+00> : vector<4x256xf32>
    %1 = vector.multi_reduction <add>, %0, %cst [0] : vector<2x4x256xf32> to vector<4x256xf32>
    %2 = vector.shape_cast %1 : vector<4x256xf32> to vector<1x4x256xf32>
    %cst_2 = arith.constant dense<0.000000e+00> : vector<1x4xf32>
    %3 = vector.multi_reduction <add>, %2, %cst_2 [2] : vector<1x4x256xf32> to vector<1x4xf32>
    %4 = vector.shape_cast %3 : vector<1x4xf32> to vector<1x4x1xf32>
    %5 = arith.mulf %0, %0 : vector<2x4x256xf32>
    %cst_3 = arith.constant dense<0.000000e+00> : vector<4x256xf32>
    %6 = vector.multi_reduction <add>, %5, %cst_3 [0] : vector<2x4x256xf32> to vector<4x256xf32>
    %7 = vector.shape_cast %6 : vector<4x256xf32> to vector<1x4x256xf32>
    %cst_4 = arith.constant dense<0.000000e+00> : vector<1x4xf32>
    %8 = vector.multi_reduction <add>, %7, %cst_4 [2] : vector<1x4x256xf32> to vector<1x4xf32>
    %9 = vector.shape_cast %8 : vector<1x4xf32> to vector<1x4x1xf32>
    %cst_5 = arith.constant 0.001953125 : f32
    %10 = vector.broadcast %cst_5 : f32 to vector<1x4x1xf32>
    %11 = arith.mulf %4, %10 : vector<1x4x1xf32>
    %12 = arith.mulf %4, %11 : vector<1x4x1xf32>
    %13 = arith.subf %9, %12 : vector<1x4x1xf32>
    %cst_6 = arith.constant 0.00195694715 : f32
    %14 = vector.broadcast %cst_6 : f32 to vector<1x4x1xf32>
    %15 = arith.mulf %13, %14 : vector<1x4x1xf32>
    %cst_7 = arith.constant 0.000000e+00 : f32
    %16 = vector.broadcast %cst_7 : f32 to vector<1x4x1xf32>
    %17 = arith.maximumf %15, %16 : vector<1x4x1xf32>
    %cst_8 = arith.constant 1.000000e-10 : f32
    %18 = vector.broadcast %cst_8 : f32 to vector<1x4x1xf32>
    %19 = arith.addf %17, %18 : vector<1x4x1xf32>
    %20 = math.sqrt %19 : vector<1x4x1xf32>
    %cst_9 = arith.constant 3.000000e+00 : f32
    %21 = vector.broadcast %cst_9 : f32 to vector<1x4x1xf32>
    %22 = arith.mulf %21, %20 : vector<1x4x1xf32>
    %23 = vector.broadcast %11 : vector<1x4x1xf32> to vector<2x4x256xf32>
    %24 = arith.subf %0, %23 : vector<2x4x256xf32>
    %25 = math.absf %24 : vector<2x4x256xf32>
    %26 = vector.broadcast %22 : vector<1x4x1xf32> to vector<2x4x256xf32>
    %27 = arith.cmpf olt, %25, %26 : vector<2x4x256xf32>
    %cst_10 = arith.constant 1.000000e+00 : f32
    %cst_11 = arith.constant 0.000000e+00 : f32
    %28 = vector.broadcast %cst_10 : f32 to vector<2x4x256xf32>
    %29 = vector.broadcast %cst_11 : f32 to vector<2x4x256xf32>
    %30 = arith.select %27, %28, %29 : vector<2x4x256xi1>, vector<2x4x256xf32>
    %cst_12 = arith.constant dense<0.000000e+00> : vector<4x256xf32>
    %31 = vector.multi_reduction <add>, %30, %cst_12 [0] : vector<2x4x256xf32> to vector<4x256xf32>
    %32 = vector.shape_cast %31 : vector<4x256xf32> to vector<1x4x256xf32>
    %cst_13 = arith.constant dense<0.000000e+00> : vector<1x4xf32>
    %33 = vector.multi_reduction <add>, %32, %cst_13 [2] : vector<1x4x256xf32> to vector<1x4xf32>
    %34 = vector.shape_cast %33 : vector<1x4xf32> to vector<1x4x1xf32>
    %cst_14 = arith.constant 0.000000e+00 : f32
    %35 = vector.broadcast %cst_14 : f32 to vector<2x4x256xf32>
    %36 = arith.select %27, %24, %35 : vector<2x4x256xi1>, vector<2x4x256xf32>
    %cst_15 = arith.constant dense<0.000000e+00> : vector<4x256xf32>
    %37 = vector.multi_reduction <add>, %36, %cst_15 [0] : vector<2x4x256xf32> to vector<4x256xf32>
    %38 = vector.shape_cast %37 : vector<4x256xf32> to vector<1x4x256xf32>
    %cst_16 = arith.constant dense<0.000000e+00> : vector<1x4xf32>
    %39 = vector.multi_reduction <add>, %38, %cst_16 [2] : vector<1x4x256xf32> to vector<1x4xf32>
    %40 = vector.shape_cast %39 : vector<1x4xf32> to vector<1x4x1xf32>
    %41 = arith.mulf %24, %24 : vector<2x4x256xf32>
    %cst_17 = arith.constant 0.000000e+00 : f32
    %42 = vector.broadcast %cst_17 : f32 to vector<2x4x256xf32>
    %43 = arith.select %27, %41, %42 : vector<2x4x256xi1>, vector<2x4x256xf32>
    %cst_18 = arith.constant dense<0.000000e+00> : vector<4x256xf32>
    %44 = vector.multi_reduction <add>, %43, %cst_18 [0] : vector<2x4x256xf32> to vector<4x256xf32>
    %45 = vector.shape_cast %44 : vector<4x256xf32> to vector<1x4x256xf32>
    %cst_19 = arith.constant dense<0.000000e+00> : vector<1x4xf32>
    %46 = vector.multi_reduction <add>, %45, %cst_19 [2] : vector<1x4x256xf32> to vector<1x4xf32>
    %47 = vector.shape_cast %46 : vector<1x4xf32> to vector<1x4x1xf32>
    %cst_20 = arith.constant 1.000000e+00 : f32
    %48 = vector.broadcast %cst_20 : f32 to vector<1x4x1xf32>
    %49 = arith.divf %48, %34 : vector<1x4x1xf32>
    %50 = arith.mulf %40, %49 : vector<1x4x1xf32>
    %51 = arith.addf %11, %50 : vector<1x4x1xf32>
    %52 = arith.mulf %47, %49 : vector<1x4x1xf32>
    %53 = arith.mulf %50, %50 : vector<1x4x1xf32>
    %54 = arith.subf %52, %53 : vector<1x4x1xf32>
    %cst_21 = arith.constant 0.000000e+00 : f32
    %55 = vector.broadcast %cst_21 : f32 to vector<1x4x1xf32>
    %56 = arith.maximumf %54, %55 : vector<1x4x1xf32>
    %c0_22 = arith.constant 0 : index
    %c0_23 = arith.constant 0 : index
    %c0_24 = arith.constant 0 : index
    %57 = vector.load %arg2[%c0_22, %c0_23, %c0_24] : memref<1x4x1xf32, #tpu.memory_space<vmem>>, vector<1x4x1xf32>
    %cst_25 = arith.constant 9.99999968E-21 : f32
    %58 = vector.broadcast %cst_25 : f32 to vector<1x4x1xf32>
    %59 = arith.addf %56, %58 : vector<1x4x1xf32>
    %60 = math.rsqrt %59 : vector<1x4x1xf32>
    %61 = arith.mulf %57, %60 : vector<1x4x1xf32>
    %c0_26 = arith.constant 0 : index
    %c0_27 = arith.constant 0 : index
    %c0_28 = arith.constant 0 : index
    %62 = vector.load %arg3[%c0_26, %c0_27, %c0_28] : memref<1x4x1xf32, #tpu.memory_space<vmem>>, vector<1x4x1xf32>
    %63 = arith.mulf %51, %61 : vector<1x4x1xf32>
    %64 = arith.subf %62, %63 : vector<1x4x1xf32>
    %65 = vector.broadcast %61 : vector<1x4x1xf32> to vector<2x4x256xf32>
    %66 = arith.mulf %0, %65 : vector<2x4x256xf32>
    %67 = vector.broadcast %64 : vector<1x4x1xf32> to vector<2x4x256xf32>
    %68 = arith.addf %66, %67 : vector<2x4x256xf32>
    %c0_29 = arith.constant 0 : index
    %c0_30 = arith.constant 0 : index
    %c0_31 = arith.constant 0 : index
    %69 = vector.load %arg4[%c0_29, %c0_30, %c0_31] : memref<2x4x256xf32, #tpu.memory_space<vmem>>, vector<2x4x256xf32>
    tpu.vector_store %arg4[%c0_29, %c0_30, %c0_31], %68 {strides = array<i32>} : memref<2x4x256xf32, #tpu.memory_space<vmem>>, vector<2x4x256xf32>,
    return
  }
  func.func @transform_0(%arg0: i32) -> (i32, i32, i32) {
    %c0_i32 = arith.constant 0 : i32
    %c0_i32_0 = arith.constant 0 : i32
    %c0_i32_1 = arith.constant 0 : i32
    return %c0_i32, %arg0, %c0_i32_0 : i32, i32, i32
  }
  func.func @transform_1(%arg0: i32) -> (i32, i32, i32) {
    %c0_i32 = arith.constant 0 : i32
    %c0_i32_0 = arith.constant 0 : i32
    %c0_i32_1 = arith.constant 0 : i32
    return %c0_i32, %arg0, %c0_i32_0 : i32, i32, i32
  }
  func.func @transform_2(%arg0: i32) -> (i32, i32, i32) {
    %c0_i32 = arith.constant 0 : i32
    %c0_i32_0 = arith.constant 0 : i32
    %c0_i32_1 = arith.constant 0 : i32
    return %c0_i32, %arg0, %c0_i32_0 : i32, i32, i32
  }
  func.func @transform_3(%arg0: i32) -> (i32, i32, i32) {
    %c0_i32 = arith.constant 0 : i32
    %c0_i32_0 = arith.constant 0 : i32
    %c0_i32_1 = arith.constant 0 : i32
    return %c0_i32, %arg0, %c0_i32_0 : i32, i32, i32
  }
}

</mosaic_0001>

<bundles_post_ra>
// kernel: bn2d_pallas.1
= control target key start
LH: loop header
LB: loop body
LE: loop exit
PB: predicated region body
PF: predicated region fallthrough
CT: control target
= control target key end

     0   :  { %vm22_vm0 = vcmask 1043456   ;;  %v212_v33 = vmov 839922192   ;;  %v71_v35 = vlaneseq  ;;  %v213_v58 = vmov 0.0   ;;  %s332_s0 = inlined_call_operand.vmem [shape: f32[2,4,256], index: 0, kind: input, shape index: {}]   ;;  %s333_s1 = inlined_call_operand.vmem [shape: f32[1,4,1], index: 1, kind: input, shape index: {}]   ;;  %s334_s2 = inlined_call_operand.vmem [shape: f32[1,4,1], index: 2, kind: input, shape index: {}]   ;;  %s335_s3 = inlined_call_operand.vmem [shape: f32[2,4,256], index: 3, kind: output, shape index: {}]  }
   0x1   :  { %v238_v0 = vld [vmem:[%s332_s0] sm:$0xff]  ;;  %v243_v1 = vld [vmem:[%s332_s0 + $0x8] sm:$0xff]  ;;  %v69_v34 = vunpack.c.l.s4 %v212_v33 }
   0x2   :  { %v18_v2 = vcombine.high %v238_v0, %v238_v0  ;;  %v19_v3 = vcombine.high %v243_v1, %v243_v1  ;;  %v23_v4 = vsel %vm22_vm0, %v238_v0, 0.0  ;;  %v24_v5 = vsel %vm22_vm0, %v243_v1, 0.0 }
   0x3   :  { %v25_v6 = vadd.f32 %v24_v5, %v23_v4  ;;  %v34_v7 = vmul.f32 %v238_v0, %v238_v0  ;;  %v35_v8 = vmul.f32 %v243_v1, %v243_v1  ;;  %v70_v37 = vunpack.c.0.s8 %v69_v34 }
   0x4   :  { %v26_v9 = vsel %vm22_vm0, %v18_v2, 0.0  ;;  %v27_v10 = vsel %vm22_vm0, %v19_v3, 0.0  ;;  %v72_v38 = vshrl.u32 %v71_v35, 7  ;;  %v214_v35 = vmov 0  }
   0x5   :  { %v28_v11 = vadd.f32 %v27_v10, %v26_v9  ;;  %v29_v12 = vsel %vm22_vm0, %v25_v6, 0.0  ;;  %v38_v13 = vcombine.high %v34_v7, %v34_v7  ;;  %v39_v14 = vcombine.high %v35_v8, %v35_v8  ;;  %202 = vset.pattern.permute.xlu1 %v214_v35  ;;  %203 = vset.pattern.permute.xlu0 %v214_v35 }
   0x6   :  { %v42_v15 = vsel %vm22_vm0, %v34_v7, 0.0  ;;  %v43_v16 = vsel %vm22_vm0, %v35_v8, 0.0  ;;  %v270_v39 = vsub.s32 %v70_v37, %v72_v38 }
   0x7   :  { %v30_v17 = vsel %vm22_vm0, %v28_v11, 0.0  ;;  %v44_v18 = vadd.f32 %v43_v16, %v42_v15  ;;  %v45_v19 = vsel %vm22_vm0, %v38_v13, 0.0  ;;  %v46_v20 = vsel %vm22_vm0, %v39_v14, 0.0 }
   0x8   :  { %v31_v21 = vadd.f32 %v30_v17, %v29_v12  ;;  %v47_v22 = vadd.f32 %v46_v20, %v45_v19 }
   0x9   :  { %v48_v23 = vsel %vm22_vm0, %v44_v18, 0.0 }
   0xa   :  { %32 = vadd.xlane.f32.xlu0 %v31_v21  ;;  %v49_v24 = vsel %vm22_vm0, %v47_v22, 0.0 }
   0xb   :  { %v50_v25 = vadd.f32 %v49_v24, %v48_v23 }
   0xe   :  { %51 = vadd.xlane.f32.xlu0 %v50_v25 }
  0x97   :  { %v33_v26 = vpop.xlane.xlu0 %32 }
  0x98   :  { %v267_v27 = vmul.f32 0.001953125, %v33_v26 }
  0x9a   :  { %v54_v28 = vmul.f32 %v267_v27, %v33_v26  ;;  %v74_v40 = vrot.slane %v267_v27, %v270_v39 }
  0x9b   :  { %v52_v29 = vpop.xlane.xlu0 %51 }
  0x9c   :  { %v55_v30 = vsub.f32 %v52_v29, %v54_v28  ;;  %v76_v44 = vsub.f32 %v238_v0, %v74_v40  ;;  %v77_v45 = vsub.f32 %v243_v1, %v74_v40 }
  0x9e   :  { %v56_v31 = vmul.f32 0.0019569471, %v55_v30  ;;  %v78_v49 = vand.u32 2147483647, %v76_v44  ;;  %v79_v50 = vand.u32 2147483647, %v77_v45  ;;  %v129_v52 = vmul.f32 %v76_v44, %v76_v44 }
  0x9f   :  { %v130_v53 = vmul.f32 %v77_v45, %v77_v45 }
  0xa0   :  { %v57_v32 = vmax.f32 %v56_v31, 0.0 }
  0xa2   :  { %v58_v36 = vadd.f32 1e-10, %v57_v32 }
  0xa4   :  { %206 = vrsqrt.f32 %v58_v36  ;;  %vm61_vm1 = vcmp.eq.f32.partialorder %v58_v36, inf  ;;  %v64_v43 = vand.u32 2147483648, %v58_v36  ;;  %vm63_vm2 = vcmp.eq.f32.partialorder %v58_v36, 0.0 }
  0xae   :  { %v207_v41 = vpop.eup %206 }
  0xaf   :  { %v60_v42 = vmul.f32 %v207_v41, %v58_v36 }
  0xb1   :  { %v62_v46 = vsel %vm61_vm1, %v58_v36, %v60_v42 }
  0xb2   :  { %v65_v47 = vsel %vm63_vm2, %v64_v43, %v62_v46 }
  0xb3   :  { %v66_v48 = vmul.f32 3.0, %v65_v47  ;;  %v158_v47 = vld [vmem:[%s333_s1] sm:$0xf] }
  0xb5   :  { %v87_v51 = vrot.slane %v66_v48, %v270_v39 }
  0xb7   :  { %vm277_vm3 = vcmp.lt.f32.partialorder %v78_v49, %v87_v51  ;;  %vm281_vm4 = vcmp.lt.f32.partialorder %v79_v50, %v87_v51  ;;  %v162_v51 = vld [vmem:[%s334_s2] sm:$0xf] }
  0xb8   :  { %v131_v56 = vsel %vm277_vm3, %v129_v52, 0.0  ;;  %v132_v57 = vsel %vm281_vm4, %v130_v53, 0.0  ;;  %v91_v59 = vsel %vm277_vm3, 1.0, %v213_v58  ;;  %v92_v60 = vsel %vm281_vm4, 1.0, %v213_v58 }
  0xb9   :  { %v135_v61 = vcombine.high %v131_v56, %v131_v56  ;;  %v136_v62 = vcombine.high %v132_v57, %v132_v57  ;;  %v139_v63 = vsel %vm22_vm0, %v131_v56, 0.0  ;;  %v140_v2 = vsel %vm22_vm0, %v132_v57, 0.0 }
  0xba   :  { %v141_v3 = vadd.f32 %v140_v2, %v139_v63  ;;  %v95_v4 = vcombine.high %v91_v59, %v91_v59  ;;  %v96_v5 = vcombine.high %v92_v60, %v92_v60  ;;  %v99_v6 = vsel %vm22_vm0, %v91_v59, 0.0 }
  0xbb   :  { %v142_v7 = vsel %vm22_vm0, %v135_v61, 0.0  ;;  %v143_v8 = vsel %vm22_vm0, %v136_v62, 0.0  ;;  %v100_v9 = vsel %vm22_vm0, %v92_v60, 0.0  ;;  %v110_v10 = vsel %vm277_vm3, %v76_v44, 0.0 }
  0xbc   :  { %v144_v11 = vadd.f32 %v143_v8, %v142_v7  ;;  %v101_v12 = vadd.f32 %v100_v9, %v99_v6  ;;  %v102_v13 = vsel %vm22_vm0, %v95_v4, 0.0  ;;  %v103_v14 = vsel %vm22_vm0, %v96_v5, 0.0 }
  0xbd   :  { %v111_v15 = vsel %vm281_vm4, %v77_v45, 0.0  ;;  %v114_v16 = vcombine.high %v110_v10, %v110_v10  ;;  %v118_v17 = vsel %vm22_vm0, %v110_v10, 0.0  ;;  %v145_v18 = vsel %vm22_vm0, %v141_v3, 0.0 }
  0xbe   :  { %v146_v19 = vsel %vm22_vm0, %v144_v11, 0.0  ;;  %v104_v20 = vadd.f32 %v103_v14, %v102_v13  ;;  %v115_v21 = vcombine.high %v111_v15, %v111_v15  ;;  %v119_v23 = vsel %vm22_vm0, %v111_v15, 0.0 }
  0xbf   :  { %v147_v22 = vadd.f32 %v146_v19, %v145_v18  ;;  %v121_v24 = vsel %vm22_vm0, %v114_v16, 0.0  ;;  %v105_v25 = vsel %vm22_vm0, %v101_v12, 0.0  ;;  %v120_v28 = vadd.f32 %v119_v23, %v118_v17 }
  0xc0   :  { %v106_v26 = vsel %vm22_vm0, %v104_v20, 0.0  ;;  %v122_v29 = vsel %vm22_vm0, %v115_v21, 0.0 }
  0xc1   :  { %148 = vadd.xlane.f32.xlu0 %v147_v22  ;;  %v107_v30 = vadd.f32 %v106_v26, %v105_v25  ;;  %v123_v31 = vadd.f32 %v122_v29, %v121_v24  ;;  %v124_v33 = vsel %vm22_vm0, %v120_v28, 0.0 }
  0xc3   :  { %108 = vadd.xlane.f32.xlu1 %v107_v30  ;;  %v125_v32 = vsel %vm22_vm0, %v123_v31, 0.0 }
  0xc4   :  { %v126_v34 = vadd.f32 %v125_v32, %v124_v33 }
  0xc7   :  { %127 = vadd.xlane.f32.xlu1 %v126_v34 }
 0x14e   :  { %v149_v41 = vpop.xlane.xlu0 %148 }
 0x150   :  { %v109_v36 = vpop.xlane.xlu1 %108 }
 0x151   :  { %208 = vrcp.f32 %v109_v36 }
 0x154   :  { %v128_v38 = vpop.xlane.xlu1 %127 }
 0x15b   :  { %v209_v37 = vpop.eup %208 }
 0x15c   :  { %v152_v40 = vmul.f32 %v209_v37, %v128_v38  ;;  %v154_v42 = vmul.f32 %v209_v37, %v149_v41 }
 0x15e   :  { %v155_v43 = vmul.f32 %v152_v40, %v152_v40  ;;  %v153_v49 = vadd.f32 %v152_v40, %v267_v27 }
 0x160   :  { %v156_v44 = vsub.f32 %v154_v42, %v155_v43 }
 0x162   :  { %v157_v45 = vmax.f32 %v156_v44, 0.0 }
 0x164   :  { %v159_v46 = vadd.f32 1e-20, %v157_v45 }
 0x166   :  { %210 = vrsqrt.f32 %v159_v46 }
 0x170   :  { %v211_v48 = vpop.eup %210 }
 0x171   :  { %v161_v50 = vmul.f32 %v211_v48, %v158_v47 }
 0x173   :  { %167 = vperm.xlu1 %202, %v161_v50   ;;  %v163_v52 = vmul.f32 %v161_v50, %v153_v49 }
 0x175   :  { %v164_v53 = vsub.f32 %v162_v51, %v163_v52 }
 0x177   :  { %181 = vperm.xlu0 %203, %v164_v53  }
 0x1f2   :  { %v168_v54 = vpop.permute.xlu1 %167 }
 0x1f3   :  { %v175_v55 = vrot.slane %v168_v54, %v270_v39 }
 0x1f5   :  { %v177_v57 = vmul.f32 %v175_v55, %v238_v0  ;;  %v178_v58 = vmul.f32 %v175_v55, %v243_v1 }
 0x1f6   :  { %v182_v56 = vpop.permute.xlu0 %181 }
 0x1f7   :  { %v189_v59 = vrot.slane %v182_v56, %v270_v39 }
 0x1f9   :  { %v191_v27 = vadd.f32 %v189_v59, %v177_v57  ;;  %v192_v60 = vadd.f32 %v189_v59, %v178_v58 }
 0x1fb   :  { %193 = vst [vmem:[%s335_s3] sm:$0xff] %v191_v27  ;;  %194 = vst [vmem:[%s335_s3 + $0x8] sm:$0xff] %v192_v60 }

</bundles_post_ra>
